<compile_context>
chip_gen: v7x
topology: tpu7x:2x2x1
jax: 0.10.0
libtpu: 0.0.40
codegen_flags: <defaults>
</compile_context>

<pallas_src>
import functools
import math

import numpy as np
import jax
import jax.numpy as jnp
from jax.experimental import pallas as pl
from jax.experimental.pallas import tpu as pltpu

# ----------------------------- config (stand-in for world.config) -----------
NUM_USERS = 256      # dataset.n_users
NUM_ITEMS = 64       # dataset.m_items
EMBED_DIM = 32       # user embedding dim (from checkpoint in the original)
GROUPS = 8           # world.config['groups']  -> num_local anchors
TRAIN_H = 0.9        # world.config['train_h']
TEST_H = 0.95        # world.config['test_h']


# ----------------------------- Pallas kernels --------------------------------
def _loca_epanechnikov_kernel(anchor_ref, user_t_ref, out_ref, *, c2):
    """Epanechnikov kernel values for one (anchor-tile x user-tile) block.

    anchor_ref: (TA, D)  row-normalized anchor embeddings (degenerate rows = 0)
    user_t_ref: (D, TU)  row-normalized user embeddings, pre-transposed
    out_ref   : (TA, TU) 0.75 * max(1 - (dist/h)^2, 0)

    c2 = 4 / (pi^2 * h^2)   so that (dist/h)^2 == acos(cos)^2 * c2.
    Degenerate anchors were zeroed in the wrapper: cos=0 -> dist=1 -> value 0
    (exactly, for h < 1).
    """
    cos = jax.lax.dot_general(
        anchor_ref[...], user_t_ref[...],
        dimension_numbers=(((1,), (0,)), ((), ())),
        preferred_element_type=jnp.float32)                       # (TA, TU)
    cos = jnp.clip(cos, -1.0, 1.0)
    acos = jnp.arccos(cos)
    out_ref[...] = 0.75 * jnp.maximum(1.0 - acos * acos * c2, 0.0)


def _loca_mask_kernel(anchor_ref, user_t_ref, out_ref, *, cos_thresh):
    """Mask-only variant for the coverage pass: (kernel != 0) as int8.

    kernel != 0  <=>  dist < h  <=>  cos > cos(pi*h/2)  (no arccos / divide).
    Degenerate anchors (zero rows) give cos = 0 <= cos_thresh (h < 1) -> 0.
    """
    cos = jax.lax.dot_general(
        anchor_ref[...], user_t_ref[...],
        dimension_numbers=(((1,), (0,)), ((), ())),
        preferred_element_type=jnp.float32)                       # (TA, TU)
    out_ref[...] = (cos > cos_thresh).astype(jnp.int8)


def _round_up(n, m):
    return ((n + m - 1) // m) * m


def _loca_pallas_call(kernel_body, anchor_m, user_t, out_dtype,
                      block_a, block_u, transcendental_per_elem):
    """Tiled (A, U) = f(anchor_m (A,D), user_t (D,U)) pallas_call with padding."""
    A, D = anchor_m.shape
    Dt, U = user_t.shape
    assert D == Dt

    # int8 native tiling is (32, 128); f32 is (8, 128).
    align_a = 32 if np.dtype(out_dtype) == np.dtype(jnp.int8) else 8
    ta = min(_round_up(block_a, align_a), _round_up(A, align_a))
    tu = min(_round_up(block_u, 128), _round_up(U, 128))

    # Pad to tile multiples (zero rows/cols are harmless and sliced off below):
    # never fall back to a full-dimension tile, so the double-buffered working
    # set stays bounded on v7x's 64 MiB VMEM.
    A_pad = _round_up(A, ta)
    U_pad = _round_up(U, tu)
    if A_pad != A:
        anchor_m = jnp.pad(anchor_m, ((0, A_pad - A), (0, 0)))
    if U_pad != U:
        user_t = jnp.pad(user_t, ((0, 0), (0, U_pad - U)))

    grid = (A_pad // ta, U_pad // tu)
    out_bytes = A_pad * U_pad * np.dtype(out_dtype).itemsize
    in_bytes = (A_pad * D * np.dtype(anchor_m.dtype).itemsize
                + (A_pad // ta) * U_pad * D * np.dtype(user_t.dtype).itemsize)
    cost = pl.CostEstimate(
        flops=2 * A_pad * U_pad * D,
        transcendentals=transcendental_per_elem * A_pad * U_pad,
        bytes_accessed=in_bytes + out_bytes)

    out = pl.pallas_call(
        kernel_body,
        out_shape=jax.ShapeDtypeStruct((A_pad, U_pad), out_dtype),
        grid_spec=pltpu.PrefetchScalarGridSpec(
            num_scalar_prefetch=0,
            grid=grid,
            in_specs=[
                pl.BlockSpec((ta, D), lambda i, j: (i, 0)),   # anchors tile
                pl.BlockSpec((D, tu), lambda i, j: (0, j)),   # users (D, tu) lane-dense
            ],
            out_specs=pl.BlockSpec((ta, tu), lambda i, j: (i, j)),
        ),
        compiler_params=pltpu.CompilerParams(
            dimension_semantics=("parallel", "parallel"),
            vmem_limit_bytes=48 * 1024 * 1024),
        cost_estimate=cost,
    )(anchor_m, user_t)

    if A_pad != A or U_pad != U:
        out = out[:A, :U]
    return out


def loca_kernel_matrix(anchor_m, user_t, h, block_a=512, block_u=1024):
    """(A, U) Epanechnikov kernel values (float32)."""
    assert 0.0 < float(h) < 1.0, "keep-fold (zeroed degenerate anchors) needs h < 1"
    c2 = 4.0 / (math.pi ** 2 * float(h) ** 2)
    body = functools.partial(_loca_epanechnikov_kernel, c2=c2)
    return _loca_pallas_call(body, anchor_m, user_t, jnp.float32,
                             block_a, block_u, transcendental_per_elem=1)


def loca_kernel_mask(anchor_m, user_t, h, block_a=512, block_u=1024,
                     use_bf16=False):
    """(A, U) int8 mask of (Epanechnikov kernel != 0) — coverage pass."""
    assert 0.0 < float(h) < 1.0, "keep-fold (zeroed degenerate anchors) needs h < 1"
    cos_thresh = math.cos(math.pi * float(h) / 2.0)
    if use_bf16:
        # ~4x MXU win on v6e/v7x; entries within ~1e-3 of cos_thresh may flip.
        anchor_m = anchor_m.astype(jnp.bfloat16)
        user_t = user_t.astype(jnp.bfloat16)
    body = functools.partial(_loca_mask_kernel, cos_thresh=cos_thresh)
    return _loca_pallas_call(body, anchor_m, user_t, jnp.int8,
                             block_a, block_u, transcendental_per_elem=0)


# ----------------------------- LOCA forward ----------------------------------
def build_kernel_matrix(user_embedding, num_items, num_local, train_h, test_h,
                        block_a=512, block_u=1024):
    """JAX/Pallas re-implementation of LOCA.build_kernel_matrix (forward())."""
    num_users, _ = user_embedding.shape
    assert num_local <= num_users, \
        'number of communities should be smaller than number of users'

    # Row-normalize once with clamped reciprocal norms (replaces the per-pair
    # denom = max(||a||*||u||, 1e-10) divide inside the kernel; differs only
    # for norms below ~1e-5, where the original clip already dominates).
    norm = jnp.linalg.norm(user_embedding, axis=1, keepdims=True)   # (U, 1)
    user_n = user_embedding * (1.0 / jnp.maximum(norm, 1e-10))      # (U, D)
    user_t = user_n.T                                               # (D, U) lane-dense RHS

    # Degenerate-row guard hoisted out of the kernel:
    # original: np.sum(a[anchor] @ a.T) == 0  ->  dist = 999  ->  kernel = 0.
    # row_sum[u] = user_embedding[u] . sum_v user_embedding[v]  (same value,
    # different float summation order than the reference).
    col_sum = jnp.sum(user_embedding, axis=0)                       # (D,)
    row_sum = user_embedding @ col_sum                              # (U,)
    keep_all = (row_sum != 0.0).astype(jnp.float32).reshape(-1, 1)  # (U, 1)

    # keep-fold: degenerate anchors become zero rows -> cos = 0 -> dist = 1 > h
    # -> kernel value exactly 0 (valid for h < 1, asserted in the kernel fns).
    anchor_all = user_n * keep_all                                  # (U, D)

    # ---- 'coverage' anchor selection -------------------------------------
    # W_mat[u, v] = 1  iff  kernel(emb, norm, test_h, anchor=u)[v] != 0.
    # The mask comes from the Pallas mask-only hot path; the greedy coverage
    # selection (originally scipy csr + argsort loop) is dense numpy glue
    # because it is data-dependent sequential control flow.
    # (W is keep_row * S with S symmetric; an upper-triangular-only pass would
    # halve the U^2 work but is skipped here for simplicity.)
    mask_test = loca_kernel_mask(anchor_all, user_t, test_h,
                                 block_a, block_u)                  # (U, U) i8
    W_init = np.asarray(jax.device_get(mask_test), dtype=np.int8)
    W = W_init.copy()
    user_anchors = np.full((num_local,), -1, dtype=int)
    for t in range(num_local):
        nnz = (W != 0).sum(axis=1)
        idx = np.nonzero(nnz)[0]
        cnt = nnz[idx]
        if len(idx) == 0:                      # coverage exhausted -> reset
            W = W_init.copy()
            nnz = (W != 0).sum(axis=1)
            idx = np.nonzero(nnz)[0]
            cnt = nnz[idx]
        for si in np.argsort(cnt)[::-1]:
            if idx[si] not in user_anchors:
                user_anchors[t] = int(idx[si])
                break
        new_covered = np.nonzero(W[user_anchors[t]])[0]
        W[:, new_covered] = 0

    # ---- train kernel matrix for chosen anchors (Pallas hot path) ---------
    anchors = jnp.asarray(np.asarray(user_anchors, dtype=np.int32))
    anchor_sel = anchor_all[anchors]            # (G, D), keep already folded in
    k_train = loca_kernel_matrix(anchor_sel, user_t, train_h,
                                 block_a, block_u)                  # (G, U)

    # item kernel is all-ones, concatenated after the user kernel per anchor
    item_kernel = jnp.ones((num_local, num_items), dtype=jnp.float32)
    train_kernel_ret = jnp.concatenate([k_train, item_kernel], axis=1).T  # (U+I, G)

    # ---- coverage stats / results string (matches original formatting) ----
    k_train_np = np.asarray(jax.device_get(k_train))
    train_coverage = []
    results = ''
    for t in range(num_local):
        cov = (np.count_nonzero(k_train_np[t]) * num_items
               / (num_users * num_items))
        train_coverage.append(cov)
        results += 'Anchor %3d coverage : %.5f' % (t, cov) + '\n'
    results += 'Coverage : %.5f (Average), %.5f (Max), %.5f (Min)' % (
        np.mean(train_coverage), max(train_coverage), min(train_coverage))

    return train_kernel_ret, results


def loca_forward(user_embedding, num_items, num_local, train_h, test_h,
                 block_a=512, block_u=1024):
    return build_kernel_matrix(user_embedding, num_items, num_local,
                               train_h, test_h, block_a, block_u)


# ----------------------------- driver ----------------------------------------
if __name__ == "__main__":
    key = jax.random.PRNGKey(0)
    # Deterministic synthetic stand-in for the torch-checkpoint user embedding.
    user_embedding = jax.random.normal(key, (NUM_USERS, EMBED_DIM),
                                       dtype=jnp.float32)

    # block_a=block_u=128 at this toy size exercises the 2-D grid (coverage
    # pass runs a (2, 2) grid, train pass (1, 2)); production defaults are
    # block_a=512, block_u=1024.
    train_kernel, results = loca_forward(user_embedding, NUM_ITEMS, GROUPS,
                                         TRAIN_H, TEST_H,
                                         block_a=128, block_u=128)
    train_kernel = jax.block_until_ready(train_kernel)

    assert train_kernel.shape == (NUM_USERS + NUM_ITEMS, GROUPS)
    assert bool(jnp.all(jnp.isfinite(train_kernel)))
    # item part of the kernel matrix is exactly 1 (np.ones(num_items))
    assert bool(jnp.all(train_kernel[NUM_USERS:, :] == 1.0))
    # user part is a valid Epanechnikov kernel value in [0, 3/4]
    assert bool(jnp.all(train_kernel >= 0.0)) and bool(
        jnp.all(train_kernel[:NUM_USERS, :] <= 0.75 + 1e-6))
    # an anchor's kernel value with itself must be the maximum 3/4
    assert bool(jnp.all(jnp.max(train_kernel[:NUM_USERS, :], axis=0) > 0.74))

    print("KERNEL_OK")
</pallas_src>

<mosaic_0001>
module attributes {stable_mosaic.version = 11 : i64} {
  func.func @_loca_mask_kernel(%arg0: i32, %arg1: i32, %arg2: memref<128x32xf32, #tpu.memory_space<vmem>>, %arg3: memref<32x128xf32, #tpu.memory_space<vmem>>, %arg4: memref<128x128xi8, #tpu.memory_space<vmem>>) attributes {dimension_semantics = [#tpu.dimension_semantics<parallel>, #tpu.dimension_semantics<parallel>], iteration_bounds = array<i64: 2, 2>, scalar_prefetch = 0 : i64, scratch_operands = 0 : i64, tpu.core_type = #tpu.core_type<tc>, window_params = [{transform_indices = @transform_0, window_bounds = array<i64: 128, 32>}, {transform_indices = @transform_1, window_bounds = array<i64: 32, 128>}, {transform_indices = @transform_2, window_bounds = array<i64: 128, 128>}]} {
    %c0 = arith.constant 0 : index
    %c0_0 = arith.constant 0 : index
    %0 = vector.load %arg2[%c0, %c0_0] : memref<128x32xf32, #tpu.memory_space<vmem>>, vector<128x32xf32>
    %c0_1 = arith.constant 0 : index
    %c0_2 = arith.constant 0 : index
    %1 = vector.load %arg3[%c0_1, %c0_2] : memref<32x128xf32, #tpu.memory_space<vmem>>, vector<32x128xf32>
    %cst = arith.constant dense<0.000000e+00> : vector<128x128xf32>
    %2 = tpu.matmul %0, %1, %cst {dimension_numbers = #tpu.dot_dimension_numbers<[1], [0], [0], [1], [0, 0, 1, 1], [], []>} : vector<128x32xf32>, vector<32x128xf32>, vector<128x128xf32> -> vector<128x128xf32>
    %cst_3 = arith.constant 7.845910e-02 : f32
    %3 = vector.broadcast %cst_3 : f32 to vector<128x128xf32>
    %4 = arith.cmpf ogt, %2, %3 : vector<128x128xf32>
    %5 = arith.extui %4 : vector<128x128xi1> to vector<128x128xi8>
    %c0_4 = arith.constant 0 : index
    %c0_5 = arith.constant 0 : index
    %6 = vector.load %arg4[%c0_4, %c0_5] : memref<128x128xi8, #tpu.memory_space<vmem>>, vector<128x128xi8>
    tpu.vector_store %arg4[%c0_4, %c0_5], %5 {strides = array<i32>} : memref<128x128xi8, #tpu.memory_space<vmem>>, vector<128x128xi8>,
    return
  }
  func.func @transform_0(%arg0: i32, %arg1: i32) -> (i32, i32) {
    %c0_i32 = arith.constant 0 : i32
    %c0_i32_0 = arith.constant 0 : i32
    return %arg0, %c0_i32 : i32, i32
  }
  func.func @transform_1(%arg0: i32, %arg1: i32) -> (i32, i32) {
    %c0_i32 = arith.constant 0 : i32
    %c0_i32_0 = arith.constant 0 : i32
    return %c0_i32, %arg1 : i32, i32
  }
  func.func @transform_2(%arg0: i32, %arg1: i32) -> (i32, i32) {
    %c0_i32 = arith.constant 0 : i32
    return %arg0, %arg1 : i32, i32
  }
}

</mosaic_0001>

<bundles_post_ra>
// kernel: tpu_custom_call.1
= control target key start
LH: loop header
LB: loop body
LE: loop exit
PB: predicated region body
PF: predicated region fallthrough
CT: control target
= control target key end

     0   :  { %7 = vsyncpa [#allocation4], 0  ;;  %s1149_s0 = inlined_call_operand.vmem [shape: f32[256,32], index: 0, kind: input, shape index: {}]   ;;  %s1150_s1 = inlined_call_operand.vmem [shape: f32[32,256], index: 1, kind: input, shape index: {}]   ;;  %s1151_s2 = inlined_call_operand.hbm [shape: s8[256,256], index: 2, kind: output, shape index: {}]  }
   0x1   :  { %9 = vsyncpa [#allocation4 + $0x1], 0  ;;  %s907_s9 = smov 0   ;;  %s909_s10 = smov 0  }
   0x2   :  { %s911_s11 = smov 0   ;;  %s913_s12 = smov 0  }
   0x3   :  { %s915_s13 = smov 0   ;;  %s917_s14 = smov 0  }
   0x4   :  { %s919_s15 = smov 0   ;;  %s921_s16 = smov 0  }
   0x5   :  { %s923_s17 = smov 0   ;;  %s925_s18 = smov 0  }
   0x6 LB: > { %s586_s19 = sadd.s32 4294967295, %s885_s18   ;;  %s587_s20 = sadd.s32 4294967294, %s885_s18   ;;  %s885_s18 = sphi %s925_s18, %s15_s18   ;;  %s881_s17 = sphi %s923_s17, %s1171_s17   ;;  %s877_s16 = sphi %s921_s16, %s1170_s16   ;;  %s873_s15 = sphi %s919_s15, %s1169_s15   ;;  %s869_s14 = sphi %s917_s14, %s1168_s14   ;;  %s865_s13 = sphi %s915_s13, %s1167_s13   ;;  %s861_s12 = sphi %s913_s12, %s1166_s12   ;;  %s857_s11 = sphi %s911_s11, %s1165_s11   ;;  %s853_s10 = sphi %s909_s10, %s1164_s10   ;;  %s849_s9 = sphi %s907_s9, %s1163_s9  }
   0x7   : > { %s24_s21 = sadd.s32 1, %s877_s16  ;;  %s27_s22 = sadd.s32 1, %s881_s17 }
   0x8   : > { %p25_p0 = scmp.ge.s32.totalorder %s24_s21, 2  ;;  %s60_s23 = sadd.s32 1, %s865_s13 }
   0x9   : > { %p67_p1 = scmp.ne.s32.totalorder %s865_s13, %s861_s12  ;;  %p68_p2 = scmp.eq.s32.totalorder %s885_s18, 0 }
   0xa   : > { %s1173_s21 = smov (%p25_p0, %s24_s21), 0  ;;  %s1175_s22 = smov (!%p25_p0, %s27_s22), %s881_s17 }
   0xb   : > { %s57_s24 = ssub.s32 %s877_s16, %s1173_s21  ;;  %p970_p3 = por %p68_p2, %p67_p1 }
   0xc   : > { %p29_p4 = scmp.ge.s32.totalorder %s1175_s22, 2  ;;  %p58_p5 = scmp.eq.s32.totalorder %s57_s24, 0 }
   0xd   : > { %s88_s26 = sadd.s32 1, %s857_s11  ;;  %p98_p6 = scmp.ne.s32.totalorder %s857_s11, %s853_s10 }
   0xe   : > { %s1177_s22 = smov (%p29_p4, %s1175_s22), 0  ;;  %p99_p7 = scmp.eq.s32.totalorder %s586_s19, 3 }
   0xf   : > { %s980_s27 = scalar_select %p58_p5, %s865_s13, %s60_s23  }
  0x10   : > { %s83_s28 = ssub.s32 %s881_s17, %s1177_s22  ;;  %p104_p8 = scmp.ne.s32.totalorder %s853_s10, %s849_s9 }
  0x11   : > { %s85_s29 = sor.u32 %s83_s28, %s57_s24  ;;  %p986_p10 = por %p99_p7, %p98_p6 }
  0x12   : > { %p86_p9 = scmp.eq.s32.totalorder %s85_s29, 0  ;;  %p105_p11 = scmp.eq.s32.totalorder %s587_s20, 3 }
  0x13   : > { %p589_p13 = scmp.ge.s32.totalorder %s885_s18, 4 }
  0x14   : > { %s991_s3 = scalar_select %p86_p9, %s857_s11, %s88_s26  }
  0x15   : > { %p993_p12 = por %p105_p11, %p104_p8  ;;  %121 = sbr.rel (%p589_p13) target bundleno = 35 (0x23), region = 16 }
  0x1c   : > { %133 = sbr.rel (!%p970_p3) target bundleno = 35 (0x23), region = 24  ;;  %s135_s5 = sand.u32 (%p970_p3), 1, %s865_s13  }
  0x1d   : > { %s591_s6 = sshll.u32 (%p970_p3), %s877_s16, 3  ;;  %s590_s7 = sshll.u32 (%p970_p3), %s135_s5, 5 }
  0x1e   : > { %s139_s20 = scalar_lea.vmem (%p970_p3), %s1150_s1, %s591_s6  ;;  %s137_s23 = scalar_lea.vmem (%p970_p3), [#allocation2], %s590_s7 }
  0x1f   : > { %v173_v0 = vld [vmem:[%s139_s20] sm:$0xff] (%p970_p3)  ;;  %v175_v1 = vld [vmem:[%s139_s20 + $0x10] sm:$0xff] (%p970_p3) }
  0x20   : > { %v177_v2 = vld [vmem:[%s139_s20 + $0x20] sm:$0xff] (%p970_p3)  ;;  %174 = vst [vmem:[%s137_s23] sm:$0xff] (%p970_p3), %v173_v0  ;;  %176 = vst [vmem:[%s137_s23 + $0x8] sm:$0xff] (%p970_p3), %v175_v1  ;;  %v179_v3 = vld [vmem:[%s139_s20 + $0x30] sm:$0xff] (%p970_p3) }
  0x21   : > { %178 = vst [vmem:[%s137_s23 + $0x10] sm:$0xff] (%p970_p3), %v177_v2  ;;  %180 = vst [vmem:[%s137_s23 + $0x18] sm:$0xff] (%p970_p3), %v179_v3 }
  0x23 PF: > { %p592_p0 = scmp.ge.s32.totalorder %s885_s18, 1  ;;  %p185_p1 = scmp.lt.s32.totalorder %s885_s18, 5 }
  0x25   : > { %p186_p2 = pnand %p592_p0, %p185_p1 }
  0x26   : > { %s192_s24 = sand.u32 (!%p186_p2), 1, %s861_s12   ;;  %s595_s25 = sshll.u32 (!%p186_p2), %s873_s15, 4  ;;  %vm247_vm0 = vcmask (!%p186_p2), 261120   ;;  %v887_v38 = vmov (!%p186_p2), 0  }
  0x27   : > { %189 = sbr.rel (%p186_p2) target bundleno = 299 (0x12b), region = 62  ;;  %s593_s26 = sshll.u32 (!%p186_p2), %s192_s24, 5 }
  0x28   : > { %p219_p3 = scmp.lt.s32.totalorder (!%p186_p2), %s595_s25, 31  ;;  %s194_s28 = scalar_lea.vmem (!%p186_p2), [#allocation2], %s593_s26 }
  0x29   : > { %v243_v4 = vld [vmem:[%s194_s28] sm:$0xff] (!%p186_p2)  ;;  %v244_v5 = vld [vmem:[%s194_s28 + $0x8] sm:$0xff] (!%p186_p2)  ;;  %v245_v6 = vld [vmem:[%s194_s28 + $0x10] sm:$0xff] (!%p186_p2)  ;;  %s215_s12 = sand.u32 (!%p186_p2), 1, %s853_s10   ;;  %s619_s19 = sshll.u32 (!%p186_p2), %s873_s15, 3 }
  0x2a   : > { %v672_v7 = vpack.c.bf16 (!%p186_p2), %v244_v5, %v243_v4  ;;  %v246_v8 = vld [vmem:[%s194_s28 + $0x18] sm:$0xff] (!%p186_p2)  ;;  %s594_s8 = sshll.u32 (!%p186_p2), %s215_s12, 5  ;;  %s490_s15 = sadd.s32 (!%p186_p2), %s869_s14, %s619_s19 }
  0x2b   : > { %v676_v9 = vpack.c.bf16 (!%p186_p2), %v246_v8, %v245_v6  ;;  %s1060_s20 = scalar_lea.vmem (!%p186_p2), [#allocation3], %s594_s8  ;;  %s616_s14 = sshll.u32 (!%p186_p2), %s490_s15, 7 }
  0x2c   : > { %673 = vmatprep.subr.bf16.mxu0 (!%p186_p2), %v672_v7  ;;  %680 = vmatprep.subr.bf16.mxu1 (!%p186_p2), %v672_v7  ;;  %s493_s23 = sshll.u32 (!%p186_p2), %s1060_s20, 4  ;;  %s1083_s26 = scalar_lea.hbm (!%p186_p2), %s1151_s2, %s616_s14  ;;  %s1076_s23 = int_to_ptr.vmem [resolvable:$true] %s493_s23 }
  0x2d   : > { %675 = vmatpush3.bf16.msra.mxu0 (!%p186_p2), %v672_v7  ;;  %682 = vmatpush3.bf16.msra.mxu1 (!%p186_p2), %v672_v7  ;;  %s1091_s28 = scalar_lea.sflag (!%p186_p2), [#allocation4], %s215_s12  ;;  %s888_s5 = smov (!%p186_p2), [#allocation3]  }
  0x2e   : > { %s1179_s25 = smov (!%p219_p3, %s595_s25), 31  ;;  %677 = vmatprep.subr.bf16.mxu0 %v676_v9  ;;  %681 = vmatprep.subr.bf16.mxu1 %v676_v9  ;;  %s779_s6 = sshll.u32 %s888_s5, 4  ;;  %s780_s6 = int_to_ptr.vmem [resolvable:$false] %s779_s6 }
  0x2f   : > { %s596_s29 = sshll.u32 %s1179_s25, 3  ;;  %p782_p7 = scmp.lt.s32.totalorder %s1076_s23, %s780_s6 }
  0x30   : > { %s1012_s7 = scalar_lea.vmem %s1149_s0, %s596_s29  ;;  %s775_s29 = scalar_lea.vmem %s1076_s23, 512 }
  0x31   : > { %v227_v10 = vld [vmem:[%s1012_s7] sm:$0xff]  ;;  %679 = vmatpush3.bf16.msra.mxu0 %v676_v9  ;;  %683 = vmatpush3.bf16.msra.mxu1 %v676_v9  ;;  %v228_v12 = vld [vmem:[%s1012_s7 + $0x8] sm:$0xff]  ;;  %v229_v14 = vld [vmem:[%s1012_s7 + $0x10] sm:$0xff]  ;;  %p776_p4 = scmp.ne.s32.totalorder %s1076_s23, %s775_s29 }
  0x32   : > { %v235_v11 = vld [vmem:[%s1012_s7 + $0x40] sm:$0xff]  ;;  %648 = vmatprep.mubr.msk.f32.mxu0 %vm247_vm0, %v227_v10  ;;  %v236_v13 = vld [vmem:[%s1012_s7 + $0x48] sm:$0xff]  ;;  %v237_v15 = vld [vmem:[%s1012_s7 + $0x50] sm:$0xff] }
  0x33   : > { %660 = vmatprep.mubr.msk.f32.mxu1 %vm247_vm0, %v235_v11  ;;  %v230_v16 = vld [vmem:[%s1012_s7 + $0x18] sm:$0xff]  ;;  %v231_v18 = vld [vmem:[%s1012_s7 + $0x20] sm:$0xff]  ;;  %v232_v20 = vld [vmem:[%s1012_s7 + $0x28] sm:$0xff]  ;;  %p777_p5 = pnand %p776_p4, %p986_p10 }
  0x34   : > { %649 = vmatmul.mubr.msk.f32.vlgmr.msra.gmra.mrb[0].mxu0 %vm247_vm0, %v228_v12  ;;  %661 = vmatmul.mubr.msk.f32.vlgmr.msra.gmra.mrb[0].mxu1 %vm247_vm0, %v236_v13  ;;  %v238_v17 = vld [vmem:[%s1012_s7 + $0x58] sm:$0xff]  ;;  %v239_v19 = vld [vmem:[%s1012_s7 + $0x60] sm:$0xff]  ;;  %v240_v21 = vld [vmem:[%s1012_s7 + $0x68] sm:$0xff] }
  0x35   : > { %651 = vmatprep.mubr.msk.f32.mxu0 %vm247_vm0, %v229_v14  ;;  %663 = vmatprep.mubr.msk.f32.mxu1 %vm247_vm0, %v237_v15  ;;  %v233_v22 = vld [vmem:[%s1012_s7 + $0x30] sm:$0xff]  ;;  %v234_v24 = vld [vmem:[%s1012_s7 + $0x38] sm:$0xff]  ;;  %p778_p6 = pneg %p777_p5 }
  0x36   : > { %v241_v23 = vld [vmem:[%s1012_s7 + $0x70] sm:$0xff]  ;;  %v242_v25 = vld [vmem:[%s1012_s7 + $0x78] sm:$0xff]  ;;  %s781_s7 = scalar_lea.vmem %s780_s6, 1024 }
  0x37   : > { %p783_p8 = scmp.lt.s32.totalorder %s781_s7, %s775_s29 }
  0x38   : > { %652 = vmatmul.mubr.msk.f32.gmra.mrb[2].mxu0 %vm247_vm0, %v230_v16  ;;  %664 = vmatmul.mubr.msk.f32.gmra.mrb[2].mxu1 %vm247_vm0, %v238_v17 }
  0x39   : > { %654 = vmatprep.mubr.msk.f32.mxu0 %vm247_vm0, %v231_v18  ;;  %666 = vmatprep.mubr.msk.f32.mxu1 %vm247_vm0, %v239_v19  ;;  %p784_p9 = por %p783_p8, %p782_p7 }
  0x3b   : > { %p785_p11 = pnand %p784_p9, %p778_p6 }
  0x3c   : > { %655 = vmatmul.mubr.msk.f32.gmra.mrb[4].mxu0 %vm247_vm0, %v232_v20  ;;  %667 = vmatmul.mubr.msk.f32.gmra.mrb[4].mxu1 %vm247_vm0, %v240_v21 }
  0x3d   : > { %657 = vmatprep.mubr.msk.f32.mxu0 %vm247_vm0, %v233_v22  ;;  %669 = vmatprep.mubr.msk.f32.mxu1 %vm247_vm0, %v241_v23 }
  0x40   : > { %658 = vmatmul.mubr.msk.f32.gmra.mrb[6].mxu0 %vm247_vm0, %v234_v24  ;;  %670 = vmatmul.mubr.msk.f32.gmra.mrb[6].mxu1 %vm247_vm0, %v242_v25 }
 0x107   : > { %v650_v26 = vpop.f32.mrb[0].mxu0  ;;  %v662_v27 = vpop.f32.mrb[0].mxu1 }
 0x108   : > { %vm442_vm1 = vcmp.gt.f32.partialorder %v650_v26, 0.0784591  ;;  %vm450_vm2 = vcmp.gt.f32.partialorder %v662_v27, 0.0784591  ;;  %v362_v28 = vpop.f32.mrb[1].mxu0  ;;  %v402_v29 = vpop.f32.mrb[1].mxu1 }
 0x109   : > { %vm441_vm3 = vcmp.gt.f32.partialorder %v362_v28, 0.0784591  ;;  %vm449_vm4 = vcmp.gt.f32.partialorder %v402_v29, 0.0784591 }
 0x10a   : > { %vm1047_vm5 = vmpackc.low %vm442_vm1, %vm441_vm3 }
 0x10b   : > { %vm1051_vm6 = vmpackc.low %vm450_vm2, %vm449_vm4  ;;  %v653_v32 = vpop.f32.mrb[2].mxu0  ;;  %v665_v33 = vpop.f32.mrb[2].mxu1 }
 0x10c   : > { %vm444_vm7 = vcmp.gt.f32.partialorder %v653_v32, 0.0784591  ;;  %v372_v34 = vpop.f32.mrb[3].mxu0  ;;  %v412_v35 = vpop.f32.mrb[3].mxu1  ;;  %vm452_vm8 = vcmp.gt.f32.partialorder %v665_v33, 0.0784591 }
 0x10d   : > { %vm443_vm9 = vcmp.gt.f32.partialorder %v372_v34, 0.0784591  ;;  %vm451_vm10 = vcmp.gt.f32.partialorder %v412_v35, 0.0784591 }
 0x10e   : > { %vm458_vm11 = vmpackc.low %vm444_vm7, %vm443_vm9 }
 0x10f   : > { %vm459_vm12 = vmpackc.even %vm458_vm11, %vm1047_vm5  ;;  %v656_v36 = vpop.f32.mrb[4].mxu0  ;;  %v668_v37 = vpop.f32.mrb[4].mxu1 }
 0x110   : > { %v469_v39 = vsel %vm459_vm12, 16843009, %v887_v38  ;;  %vm464_vm13 = vmpackc.low %vm452_vm8, %vm451_vm10  ;;  %vm446_vm14 = vcmp.gt.f32.partialorder %v656_v36, 0.0784591  ;;  %vm454_vm0 = vcmp.gt.f32.partialorder %v668_v37, 0.0784591 }
 0x111   : > { %473 = vst [vmem:[%s1060_s20] sm:$0xff] %v469_v39  ;;  %vm465_vm15 = vmpackc.even %vm464_vm13, %vm1051_vm6  ;;  %v382_v40 = vpop.f32.mrb[5].mxu0  ;;  %v422_v41 = vpop.f32.mrb[5].mxu1 }
 0x112   : > { %v471_v42 = vsel %vm465_vm15, 16843009, %v887_v38  ;;  %vm445_vm1 = vcmp.gt.f32.partialorder %v382_v40, 0.0784591  ;;  %vm453_vm2 = vcmp.gt.f32.partialorder %v422_v41, 0.0784591 }
 0x113   : > { %475 = vst [vmem:[%s1060_s20 + $0x10] sm:$0xff] %v471_v42  ;;  %vm1067_vm3 = vmpackc.low %vm446_vm14, %vm445_vm1  ;;  %v659_v44 = vpop.f32.mrb[6].mxu0  ;;  %v671_v45 = vpop.f32.mrb[6].mxu1 }
 0x114   : > { %vm1072_vm4 = vmpackc.low %vm454_vm0, %vm453_vm2  ;;  %vm448_vm5 = vcmp.gt.f32.partialorder %v659_v44, 0.0784591  ;;  %v392_v47 = vpop.f32.mrb[7].mxu0  ;;  %v432_v48 = vpop.f32.mrb[7].mxu1  ;;  %vm456_vm6 = vcmp.gt.f32.partialorder %v671_v45, 0.0784591 }
 0x115   : > { %vm447_vm7 = vcmp.gt.f32.partialorder %v392_v47, 0.0784591  ;;  %vm455_vm8 = vcmp.gt.f32.partialorder %v432_v48, 0.0784591 }
 0x116   : > { %vm461_vm9 = vmpackc.low %vm448_vm5, %vm447_vm7 }
 0x117   : > { %vm462_vm10 = vmpackc.even %vm461_vm9, %vm1067_vm3 }
 0x118   : > { %v470_v49 = vsel %vm462_vm10, 16843009, %v887_v38  ;;  %vm467_vm11 = vmpackc.low %vm456_vm6, %vm455_vm8 }
 0x119   : > { %474 = vst [vmem:[%s1060_s20 + $0x8] sm:$0xff] %v470_v49  ;;  %vm468_vm12 = vmpackc.even %vm467_vm11, %vm1072_vm4 }
 0x11a   : > { %v472_v50 = vsel %vm468_vm12, 16843009, %v887_v38 }
 0x11b   : > { %476 = vst [vmem:[%s1060_s20 + $0x18] sm:$0xff] %v472_v50 }
 0x11c   : > { %788 = shalt.err (!%p785_p11)
}
 0x11d   : > { %s789_s12 = scalar_lea.hbm %s1083_s26, 512  ;;  %s793_s20 = scalar_lea.hbm %s1151_s2, 2048 }
 0x11e   : > { %p790_p13 = scmp.ne.s32.totalorder %s1083_s26, %s789_s12  ;;  %p794_p2 = scmp.lt.u32.totalorder %s1083_s26, %s1151_s2 }
 0x11f   : > { %p795_p3 = scmp.lt.u32.totalorder %s793_s20, %s789_s12  ;;  %p797_p5 = scmp.lt.u32.totalorder %s789_s12, %s1083_s26 }
 0x120   : > { %p791_p0 = pnand %p790_p13, %p986_p10 }
 0x121   : > { %p796_p4 = por %p795_p3, %p794_p2 }
 0x122   : > { %p792_p1 = pneg %p791_p0 }
 0x123   : > { %p798_p6 = por %p797_p5, %p796_p4 }
 0x125   : > { %p799_p7 = pnand %p798_p6, %p792_p1 }
 0x127   : > { %802 = shalt.err (!%p799_p7)
}
 0x128   : > { %s889_s24 = smov 128   ;;  %s890_s25 = smov 256  }
 0x129   : > { %s891_s29 = smov 8  }
 0x12a   : > { %684 = dma.vmem_to_hbm [thread:$0]  (%p986_p10), %s1076_s23, 512, %s1083_s26, %s1091_s28, %s889_s24, %s890_s25, %s891_s29  }
 0x12b PF: > { %p690_p8 = scmp.ge.s32.totalorder %s885_s18, 2  ;;  %s508_s5 = sand.u32 1, %s849_s9  }
 0x12c   : > { %s509_s6 = scalar_lea.sflag [#allocation4], %s508_s5 }
 0x12d   : > { %p687_p9 = pnand %p690_p8, %p993_p12 }
 0x12f   : > { %844 = dma.done.wait (!%p687_p9), %s509_s6, 512  }
 0x130   : > { %846 = vsyncadd (!%p687_p9), %s509_s6, 4294966784  ;;  %s15_s18 = sadd.s32 1, %s885_s18   ;;  %s1163_s9 = smov %s853_s10 }
 0x131   : > { %p12_p11 = scmp.ge.s32.totalorder %s15_s18, 6   ;;  %s1164_s10 = smov %s857_s11 }
 0x132   : > { %s1165_s11 = smov %s991_s3  ;;  %s1166_s12 = smov %s865_s13 }
 0x133   : > { %s1167_s13 = smov %s980_s27  ;;  %s1168_s14 = smov %s877_s16 }
 0x134   : > { %s1169_s15 = smov %s881_s17  ;;  %s1170_s16 = smov %s1173_s21 }
 0x135   : > { %s1171_s17 = smov %s1177_s22  ;;  %14 = sbr.rel (!%p12_p11) target bundleno = 6 (0x6), region = 109 }
 0x13c   :  { %514 = vsyncpa [#allocation4], 1 }
 0x13d   :  { %516 = vsyncpa [#allocation4 + $0x1], 1 }

</bundles_post_ra>
